<compile_context>
chip_gen: v6e
topology: v6e:2x2x1
jax: 0.10.0
libtpu: 0.0.40
codegen_flags: <defaults>
</compile_context>

<pallas_src>
import jax
import jax.numpy as jnp
from jax.experimental import pallas as pl
from jax.experimental.pallas import tpu as pltpu


# ---------------------------------------------------------------------------
# Hardware-aware tiling helpers
# ---------------------------------------------------------------------------
def _tpu_vmem_bytes():
    """VMEM per TensorCore; conservative (v7x-sized) fallback if query fails."""
    try:
        return int(pltpu.get_tpu_info().vmem_capacity_bytes)
    except Exception:
        return 64 << 20


def _tile_plan(batch, bytes_per_batch_row, n_streams):
    """Pick a batch tile `tb` and a scoped-VMEM limit.

    bytes_per_batch_row : bytes of ONE batch element of ONE streamed array.
    n_streams           : tile-sized arrays that get double-buffered (in+out).
    """
    vmem = _tpu_vmem_bytes()
    if vmem >= (100 << 20):
        # v5e / v6e: 128 MiB VMEM, single TensorCore -> big blocks amortize the
        # ~0.35us per-grid-step overhead; only need a couple of grid steps.
        block_budget = 12 << 20
        min_steps = 2
        vmem_cap = 96 << 20
    else:
        # v7x: 64 MiB VMEM, 2 TCs share the "parallel" grid -> >=4 steps so
        # each core still has DMA/compute overlap; tighter scoped limit.
        block_budget = 6 << 20
        min_steps = 4
        vmem_cap = 32 << 20

    max_tb = max(batch // min_steps, 1) if batch > 1 else 1
    tb = 1
    for cand in range(max_tb, 0, -1):
        if batch % cand == 0 and cand * bytes_per_batch_row <= block_budget:
            tb = cand
            break

    # 2x double-buffer per streamed array + slack for params / internal scratch.
    need = 2 * n_streams * tb * bytes_per_batch_row + (2 << 20)
    vmem_limit = max(need, 16 << 20)
    if vmem_limit > vmem_cap:
        # TODO(synk): for feature maps where even tb=1 exceeds the budget,
        # chunk the HW axis in-kernel (pltpu.emit_pipeline) instead of only
        # raising the scoped limit.
        vmem_limit = min(vmem_limit, int(0.85 * vmem))
    return tb, int(vmem_limit)


# ---------------------------------------------------------------------------
# Branch.forward mask fusion:  f = g*mask + l*nmask  (even channels <- g)
# ---------------------------------------------------------------------------
def branch_mask_fuse_kernel(g_ref, l_ref, o_ref):
    # (tb, C, HW) tiles.  One compare/select pass; kernel is HBM-BW bound.
    ch = jax.lax.broadcasted_iota(jnp.int32, o_ref.shape, 1)
    o_ref[...] = jnp.where((ch % 2) == 0, g_ref[...], l_ref[...])


def branch_mask_fuse(g, l):
    assert g.shape == l.shape and g.dtype == l.dtype
    B, C, H, W = g.shape
    HW = H * W
    g3 = g.reshape(B, C, HW)
    l3 = l.reshape(B, C, HW)

    row_bytes = C * HW * g.dtype.itemsize
    tb, vmem_limit = _tile_plan(B, row_bytes, n_streams=3)

    out3 = pl.pallas_call(
        branch_mask_fuse_kernel,
        out_shape=jax.ShapeDtypeStruct((B, C, HW), g.dtype),
        grid=(B // tb,),
        in_specs=[
            pl.BlockSpec((tb, C, HW), lambda b: (b, 0, 0)),
            pl.BlockSpec((tb, C, HW), lambda b: (b, 0, 0)),
        ],
        out_specs=pl.BlockSpec((tb, C, HW), lambda b: (b, 0, 0)),
        compiler_params=pltpu.CompilerParams(
            dimension_semantics=("parallel",),
            vmem_limit_bytes=vmem_limit,
        ),
        cost_estimate=pl.CostEstimate(
            flops=int(2 * B * C * HW),
            transcendentals=0,
            bytes_accessed=int(3 * B * C * HW * g.dtype.itemsize),
        ),
    )(g3, l3)
    return out3.reshape(B, C, H, W)


# ---------------------------------------------------------------------------
# CBAM channel gate (the kernel the performance review targeted), improved.
# ---------------------------------------------------------------------------
def channel_gate_kernel(x_ref, w1_ref, b1_ref, w2_ref, b2_ref, o_ref):
    # x_ref : (tb, C, HW) input tile, HW is the TRUE spatial size (no padding)
    # w1_ref: (C, Cr)  b1_ref: (1, Cr)   first Linear
    # w2_ref: (Cr, C)  b2_ref: (1, C)    second Linear
    # o_ref : (tb, C, HW) gated output tile
    _, _, hw = x_ref.shape

    # ---- pass 1: fused spatial avg + max pooling (f32 accumulation) --------
    xf = x_ref[...].astype(jnp.float32)
    avg_p = jnp.sum(xf, axis=-1) * (1.0 / hw)          # (tb, C)
    max_p = jnp.max(xf, axis=-1)                       # (tb, C)
    # xf dies here: the big tile is NOT kept live across the MLP, so the store
    # pass below re-streams x_ref from VMEM instead of forcing spill copies.

    # ---- tiny MLP on each pooled vector (two separate dots: avoids the
    #      sublane-misaligned concat when tb % 8 != 0) -----------------------
    def mlp(p):
        h = jnp.dot(p, w1_ref[...], preferred_element_type=jnp.float32) + b1_ref[...]
        h = jnp.maximum(h, 0.0)
        return jnp.dot(h, w2_ref[...], preferred_element_type=jnp.float32) + b2_ref[...]

    scale = jax.nn.sigmoid(mlp(avg_p) + mlp(max_p))    # (tb, C), sigmoid on EUP

    # ---- pass 2: re-read x_ref and write the gated tile (lane-dense store) --
    o_ref[...] = (x_ref[...].astype(jnp.float32) * scale[:, :, None]).astype(o_ref.dtype)


def channel_gate(x_nchw, w1, b1, w2, b2):
    """x_nchw: (B, C, H, W) f32 or bf16.  Returns same shape/dtype."""
    B, C, H, W = x_nchw.shape
    Cr = w1.shape[1]
    HW = H * W
    # No jnp.pad / output slice: block last dim == full HW, Mosaic masks the
    # last lane slab internally (saves a full extra HBM read+write of x).
    x3 = x_nchw.reshape(B, C, HW)

    row_bytes = C * HW * x_nchw.dtype.itemsize
    tb, vmem_limit = _tile_plan(B, row_bytes, n_streams=2)

    param_bytes = (w1.size + w2.size + b1.size + b2.size) * 4
    cost = pl.CostEstimate(
        flops=int(8 * B * C * Cr + 4 * B * C * HW),
        transcendentals=int(B * C),
        bytes_accessed=int(2 * B * C * HW * x_nchw.dtype.itemsize + param_bytes),
    )

    out3 = pl.pallas_call(
        channel_gate_kernel,
        out_shape=jax.ShapeDtypeStruct((B, C, HW), x_nchw.dtype),
        grid=(B // tb,),
        in_specs=[
            pl.BlockSpec((tb, C, HW), lambda b: (b, 0, 0)),   # x: batch-tiled
            pl.BlockSpec((C, Cr), lambda b: (0, 0)),          # w1: resident
            pl.BlockSpec((1, Cr), lambda b: (0, 0)),          # b1: resident
            pl.BlockSpec((Cr, C), lambda b: (0, 0)),          # w2: resident
            pl.BlockSpec((1, C), lambda b: (0, 0)),           # b2: resident
        ],
        out_specs=pl.BlockSpec((tb, C, HW), lambda b: (b, 0, 0)),
        compiler_params=pltpu.CompilerParams(
            dimension_semantics=("parallel",),
            vmem_limit_bytes=vmem_limit,
        ),
        cost_estimate=cost,
    )(
        x3,
        w1.astype(jnp.float32),
        b1.reshape(1, -1).astype(jnp.float32),
        w2.astype(jnp.float32),
        b2.reshape(1, -1).astype(jnp.float32),
    )
    return out3.reshape(B, C, H, W)


# ---------------------------------------------------------------------------
# References
# ---------------------------------------------------------------------------
def branch_mask_fuse_ref(g, l):
    C = g.shape[1]
    even = (jnp.arange(C) % 2 == 0).astype(g.dtype)[None, :, None, None]
    return g * even + l * (1 - even)


def channel_gate_ref(x, w1, b1, w2, b2):
    B, C, H, W = x.shape
    xf = x.astype(jnp.float32).reshape(B, C, H * W)
    avg_p = jnp.mean(xf, axis=-1)
    max_p = jnp.max(xf, axis=-1)

    def mlp(p):
        return jnp.maximum(p @ w1 + b1, 0.0) @ w2 + b2

    scale = jax.nn.sigmoid(mlp(avg_p) + mlp(max_p))
    out = x.astype(jnp.float32) * scale[:, :, None, None]
    return out.astype(x.dtype)


if __name__ == "__main__":
    key = jax.random.PRNGKey(0)
    kg, kl, kw = jax.random.split(key, 3)

    # ---- Branch.forward input fusion: even channels from g, odd from l -----
    B, C, H, W = 2, 256, 16, 16
    g = jax.random.normal(kg, (B, C, H, W), dtype=jnp.float32)
    l = jax.random.normal(kl, (B, C, H, W), dtype=jnp.float32)
    f = jax.block_until_ready(branch_mask_fuse(g, l))
    assert f.shape == (B, C, H, W)
    assert jnp.allclose(f, branch_mask_fuse_ref(g, l), atol=1e-6, rtol=1e-6), \
        "branch mask fusion mismatch"

    # ---- channel gate cases --------------------------------------------------
    def run_gate(B, C, H, W, ratio, k, dtype, tol):
        Cr = max(C // ratio, 1)
        kx, k1, k2, k3, k4 = jax.random.split(k, 5)
        x = jax.random.normal(kx, (B, C, H, W), dtype=jnp.float32).astype(dtype)
        w1 = jax.random.normal(k1, (C, Cr), dtype=jnp.float32) * 0.1
        b1 = jax.random.normal(k2, (Cr,), dtype=jnp.float32) * 0.1
        w2 = jax.random.normal(k3, (Cr, C), dtype=jnp.float32) * 0.1
        b2 = jax.random.normal(k4, (C,), dtype=jnp.float32) * 0.1
        out = jax.block_until_ready(channel_gate(x, w1, b1, w2, b2))
        ref = channel_gate_ref(x, w1, b1, w2, b2)
        assert out.shape == (B, C, H, W) and out.dtype == x.dtype
        assert jnp.allclose(out.astype(jnp.float32), ref.astype(jnp.float32),
                            atol=tol, rtol=tol), "channel gate mismatch"

    ka, kb, kc = jax.random.split(kw, 3)
    run_gate(2, 32, 16, 16, 16, ka, jnp.float32, 1e-5)   # HW=256, lane-aligned
    run_gate(2, 32, 7, 9, 16, kb, jnp.float32, 1e-5)     # HW=63: no pad, full-dim block
    run_gate(2, 32, 16, 16, 16, kc, jnp.bfloat16, 5e-2)  # bf16 I/O, f32 internals

    print("KERNEL_OK")
</pallas_src>

<mosaic_0001>
module attributes {stable_mosaic.version = 11 : i64} {
  func.func @branch_mask_fuse_kernel(%arg0: i32, %arg1: memref<1x256x256xf32, #tpu.memory_space<vmem>>, %arg2: memref<1x256x256xf32, #tpu.memory_space<vmem>>, %arg3: memref<1x256x256xf32, #tpu.memory_space<vmem>>) attributes {dimension_semantics = [#tpu.dimension_semantics<parallel>], iteration_bounds = array<i64: 2>, scalar_prefetch = 0 : i64, scratch_operands = 0 : i64, tpu.core_type = #tpu.core_type<tc>, window_params = [{transform_indices = @transform_0, window_bounds = array<i64: 1, 256, 256>}, {transform_indices = @transform_1, window_bounds = array<i64: 1, 256, 256>}, {transform_indices = @transform_2, window_bounds = array<i64: 1, 256, 256>}]} {
    %0 = tpu.iota {dimensions = array<i32: 1>} : vector<1x256x256xi32>
    %c2_i32 = arith.constant 2 : i32
    %c0_i32 = arith.constant 0 : i32
    %1 = arith.cmpi eq, %c2_i32, %c0_i32 : i32
    %c1_i32 = arith.constant 1 : i32
    %2 = arith.select %1, %c1_i32, %c2_i32 : i32
    %3 = vector.broadcast %2 : i32 to vector<1x256x256xi32>
    %4 = arith.remsi %0, %3 : vector<1x256x256xi32>
    %c0_i32_0 = arith.constant 0 : i32
    %5 = vector.broadcast %c0_i32_0 : i32 to vector<1x256x256xi32>
    %6 = arith.cmpi ne, %4, %5 : vector<1x256x256xi32>
    %c0_i32_1 = arith.constant 0 : i32
    %7 = vector.broadcast %c0_i32_1 : i32 to vector<1x256x256xi32>
    %8 = arith.cmpi slt, %4, %7 : vector<1x256x256xi32>
    %c0_i32_2 = arith.constant 0 : i32
    %9 = arith.cmpi slt, %2, %c0_i32_2 : i32
    %10 = vector.broadcast %9 : i1 to vector<1x256x256xi1>
    %11 = vector.broadcast %10 : vector<1x256x256xi1> to vector<1x256x256xi1>
    %12 = arith.xori %8, %11 : vector<1x256x256xi1>
    %13 = arith.andi %12, %6 : vector<1x256x256xi1>
    %14 = vector.broadcast %2 : i32 to vector<1x256x256xi32>
    %15 = arith.addi %4, %14 : vector<1x256x256xi32>
    %16 = arith.select %13, %15, %4 : vector<1x256x256xi1>, vector<1x256x256xi32>
    %c0_i32_3 = arith.constant 0 : i32
    %17 = vector.broadcast %c0_i32_3 : i32 to vector<1x256x256xi32>
    %18 = arith.cmpi eq, %16, %17 : vector<1x256x256xi32>
    %c0 = arith.constant 0 : index
    %c0_4 = arith.constant 0 : index
    %c0_5 = arith.constant 0 : index
    %19 = vector.load %arg1[%c0, %c0_4, %c0_5] : memref<1x256x256xf32, #tpu.memory_space<vmem>>, vector<1x256x256xf32>
    %c0_6 = arith.constant 0 : index
    %c0_7 = arith.constant 0 : index
    %c0_8 = arith.constant 0 : index
    %20 = vector.load %arg2[%c0_6, %c0_7, %c0_8] : memref<1x256x256xf32, #tpu.memory_space<vmem>>, vector<1x256x256xf32>
    %21 = arith.select %18, %19, %20 : vector<1x256x256xi1>, vector<1x256x256xf32>
    %c0_9 = arith.constant 0 : index
    %c0_10 = arith.constant 0 : index
    %c0_11 = arith.constant 0 : index
    %22 = vector.load %arg3[%c0_9, %c0_10, %c0_11] : memref<1x256x256xf32, #tpu.memory_space<vmem>>, vector<1x256x256xf32>
    tpu.vector_store %arg3[%c0_9, %c0_10, %c0_11], %21 {strides = array<i32>} : memref<1x256x256xf32, #tpu.memory_space<vmem>>, vector<1x256x256xf32>,
    return
  }
  func.func @transform_0(%arg0: i32) -> (i32, i32, i32) {
    %c0_i32 = arith.constant 0 : i32
    %c0_i32_0 = arith.constant 0 : i32
    %c0_i32_1 = arith.constant 0 : i32
    return %arg0, %c0_i32, %c0_i32_0 : i32, i32, i32
  }
  func.func @transform_1(%arg0: i32) -> (i32, i32, i32) {
    %c0_i32 = arith.constant 0 : i32
    %c0_i32_0 = arith.constant 0 : i32
    %c0_i32_1 = arith.constant 0 : i32
    return %arg0, %c0_i32, %c0_i32_0 : i32, i32, i32
  }
  func.func @transform_2(%arg0: i32) -> (i32, i32, i32) {
    %c0_i32 = arith.constant 0 : i32
    %c0_i32_0 = arith.constant 0 : i32
    %c0_i32_1 = arith.constant 0 : i32
    return %arg0, %c0_i32, %c0_i32_0 : i32, i32, i32
  }
}

</mosaic_0001>

<bundles_post_ra>
// kernel: tpu_custom_call.1
= control target key start
LH: loop header
LB: loop body
LE: loop exit
PB: predicated region body
PF: predicated region fallthrough
CT: control target
= control target key end

     0   :  { %7 = vsyncpa [#allocation3], 0  ;;  %s1983_s0 = inlined_call_operand.hbm [shape: f32[2,256,256], index: 0, kind: input, shape index: {}]   ;;  %s1984_s1 = inlined_call_operand.hbm [shape: f32[2,256,256], index: 1, kind: input, shape index: {}]   ;;  %s1985_s2 = inlined_call_operand.hbm [shape: f32[2,256,256], index: 2, kind: output, shape index: {}]  }
   0x1   :  { %9 = vsyncpa [#allocation3 + $0x1], 0 }
   0x2   :  { %10 = vsyncpa [#allocation6], 0 }
   0x3   :  { %12 = vsyncpa [#allocation6 + $0x1], 0 }
   0x4   :  { %13 = vsyncpa [#allocation4], 0 }
   0x5   :  { %15 = vsyncpa [#allocation4 + $0x1], 0  ;;  %s1241_s9 = smov 0   ;;  %s1243_s10 = smov 0  }
   0x6   :  { %s1245_s11 = smov 0   ;;  %s1247_s12 = smov 0  }
   0x7 LB: > { %s1262_s13 = sadd.s32 4294967295, %s1217_s12   ;;  %s1017_s14 = sadd.s32 4294967294, %s1217_s12   ;;  %s1217_s12 = sphi %s1247_s12, %s2065_s12   ;;  %s1213_s11 = sphi %s1245_s11, %s2064_s11   ;;  %s1209_s10 = sphi %s1243_s10, %s2063_s10   ;;  %s1205_s9 = sphi %s1241_s9, %s2062_s9  }
   0x8   : > { %s1266_s15 = sadd.s32 1, %s1217_s12   ;;  %s28_s16 = sadd.s32 1, %s1213_s11 }
   0x9   : > { %s25_s17 = ssub.s32 %s1217_s12, %s1266_s15  ;;  %p35_p0 = scmp.ne.s32.totalorder %s1213_s11, %s1209_s10 }
   0xa   : > { %p26_p1 = scmp.eq.s32.totalorder %s25_s17, 0  ;;  %p36_p2 = scmp.eq.s32.totalorder %s1217_s12, 0 }
   0xb   : > { %p41_p3 = scmp.ne.s32.totalorder %s1209_s10, %s1205_s9  ;;  %p42_p4 = scmp.eq.s32.totalorder %s1262_s13, 0 }
   0xc   : > { %s1278_s18 = scalar_select %p26_p1, %s1213_s11, %s28_s16  }
   0xd   : > { %p1280_p5 = por %p36_p2, %p35_p0  ;;  %p1284_p6 = por %p42_p4, %p41_p3 }
   0xe   : > { %p91_p7 = scmp.eq.s32.totalorder %s1262_s13, 1  ;;  %p97_p8 = scmp.eq.s32.totalorder %s1017_s14, 1 }
   0xf   : > { %s1989_s20 = scalar_select %p1284_p6, 1, 0 }
  0x10   : > { %p1055_p10 = scmp.lt.s32.totalorder %s1217_s12, 2  ;;  %p1291_p11 = por %p91_p7, %p35_p0 }
  0x11   : > { %p1295_p12 = por %p97_p8, %p41_p3  ;;  %s1300_s23 = sand.u32 1, %s1213_s11  }
  0x12   : > { %s1990_s21 = scalar_select %p1291_p11, 1, 0 }
  0x13   : > { %s1991_s22 = scalar_select %p1295_p12, 1, 0 }
  0x14   : > { %s1035_s24 = sshll.u32 %s1217_s12, 13  ;;  %s1020_s25 = sshll.u32 %s1300_s23, 9 }
  0x15   : > { %s1309_s28 = scalar_lea.hbm %s1983_s0, %s1035_s24  ;;  %s121_s29 = scalar_lea.vmem [#allocation2], %s1020_s25 }
  0x16   : > { %s128_s30 = sshll.u32 %s121_s29, 4  ;;  %p1315_p13 = pnand %p1055_p10, %p1280_p5  ;;  %s1319_s30 = int_to_ptr.vmem [resolvable:$true] %s128_s30 }
  0x17   : > { %s118_s4 = scalar_lea.sflag [#allocation3], %s1300_s23  ;;  %s1093_s5 = scalar_lea.hbm %s1309_s28, 8192 }
  0x18   : > { %p1094_p0 = scmp.ne.s32.totalorder %s1309_s28, %s1093_s5  ;;  %p1095_p1 = pneg %p1315_p13 }
  0x19   : > { %s1098_s8 = scalar_lea.hbm %s1983_s0, 16384  ;;  %p1099_p4 = scmp.lt.s32.totalorder %s1309_s28, %s1983_s0 }
  0x1a   : > { %p1096_p2 = pnand %p1095_p1, %p1094_p0  ;;  %p1100_p5 = scmp.lt.s32.totalorder %s1098_s8, %s1093_s5 }
  0x1c   : > { %p1097_p3 = pneg %p1096_p2  ;;  %p1101_p7 = por %p1100_p5, %p1099_p4 }
  0x1e   : > { %p1102_p8 = pnand %p1101_p7, %p1097_p3 }
  0x20   : > { %1105 = shalt.err (!%p1102_p8)
}
  0x21   : > { %s1106_s17 = scalar_lea.vmem %s1319_s30, 8192  ;;  %s1219_s19 = smov [#allocation2]  }
  0x22   : > { %p1107_p10 = scmp.ne.s32.totalorder %s1319_s30, %s1106_s17  ;;  %s1111_s26 = sshll.u32 %s1219_s19, 4  ;;  %s1112_s26 = int_to_ptr.vmem [resolvable:$false] %s1111_s26 }
  0x23   : > { %s1113_s27 = scalar_lea.vmem %s1112_s26, 16384  ;;  %p1114_p9 = scmp.lt.s32.totalorder %s1319_s30, %s1112_s26 }
  0x24   : > { %p1109_p0 = pnand %p1107_p10, %p1095_p1  ;;  %p1115_p12 = scmp.lt.s32.totalorder %s1113_s27, %s1106_s17 }
  0x26   : > { %p1110_p2 = pneg %p1109_p0  ;;  %p1116_p11 = por %p1115_p12, %p1114_p9 }
  0x28   : > { %p1117_p4 = pnand %p1116_p11, %p1110_p2 }
  0x2a   : > { %1120 = shalt.err (!%p1117_p4)
}
  0x2b   : > { %s1220_s29 = smov 256   ;;  %s1221_s5 = smov 16  }
  0x2c   : > { %1047 = dma.hbm_to_vmem [thread:$0]  (!%p1315_p13), %s1309_s28, 8192, %s1319_s30, %s118_s4, %s1220_s29, %s1220_s29, %s1221_s5  }
  0x2d   : > { %p1026_p9 = scmp.ge.s32.totalorder %s1217_s12, 1  ;;  %p157_p11 = scmp.lt.s32.totalorder %s1217_s12, 3 }
  0x2e   : > { %s1362_s14 = scalar_lea.hbm %s1984_s1, %s1035_s24  ;;  %s142_s16 = scalar_lea.vmem [#allocation5], %s1020_s25 }
  0x2f   : > { %p1353_p12 = pnand %p1026_p9, %p157_p11  ;;  %s149_s17 = sshll.u32 %s142_s16, 4  ;;  %s1366_s17 = int_to_ptr.vmem [resolvable:$true] %s149_s17 }
  0x30   : > { %s139_s28 = scalar_lea.sflag [#allocation6], %s1300_s23  ;;  %s1121_s30 = scalar_lea.hbm %s1362_s14, 8192 }
  0x31   : > { %p1122_p3 = scmp.ne.s32.totalorder %s1362_s14, %s1121_s30  ;;  %s1126_s24 = scalar_lea.hbm %s1984_s1, 16384 }
  0x32   : > { %p1127_p8 = scmp.lt.s32.totalorder %s1362_s14, %s1984_s1  ;;  %p1128_p10 = scmp.lt.s32.totalorder %s1126_s24, %s1121_s30 }
  0x33   : > { %p1124_p5 = pnand %p1122_p3, %p1095_p1 }
  0x34   : > { %p1129_p0 = por %p1128_p10, %p1127_p8 }
  0x35   : > { %p1125_p7 = pneg %p1124_p5 }
  0x37   : > { %p1130_p2 = pnand %p1129_p0, %p1125_p7 }
  0x39   : > { %1133 = shalt.err (!%p1130_p2)
}
  0x3a   : > { %s1134_s23 = scalar_lea.vmem %s1366_s17, 8192  ;;  %s1222_s25 = smov [#allocation5]  }
  0x3b   : > { %p1135_p4 = scmp.ne.s32.totalorder %s1366_s17, %s1134_s23  ;;  %s1139_s7 = sshll.u32 %s1222_s25, 4  ;;  %s1140_s7 = int_to_ptr.vmem [resolvable:$false] %s1139_s7 }
  0x3c   : > { %s1141_s8 = scalar_lea.vmem %s1140_s7, 16384  ;;  %p1142_p3 = scmp.lt.s32.totalorder %s1366_s17, %s1140_s7 }
  0x3d   : > { %p1137_p9 = pnand %p1135_p4, %p1095_p1  ;;  %p1143_p5 = scmp.lt.s32.totalorder %s1141_s8, %s1134_s23 }
  0x3f   : > { %p1138_p11 = pneg %p1137_p9  ;;  %p1144_p6 = por %p1143_p5, %p1142_p3 }
  0x41   : > { %p1145_p8 = pnand %p1144_p6, %p1138_p11 }
  0x43   : > { %1148 = shalt.err (!%p1145_p8)
}
  0x44   : > { %1050 = dma.hbm_to_vmem [thread:$0]  (!%p1315_p13), %s1362_s14, 8192, %s1366_s17, %s139_s28, %s1220_s29, %s1220_s29, %s1221_s5  }
  0x45   : > { %161 = sbr.rel (%p1353_p12) target bundleno = 146 (0x92), region = 28  ;;  %s1397_s16 = sand.u32 (!%p1353_p12), 1, %s1209_s10  }
  0x46   : > { %s1400_s30 = sshll.u32 (!%p1353_p12), %s1397_s16, 9  ;;  %s164_s4 = scalar_lea.sflag (!%p1353_p12), [#allocation3], %s1397_s16 }
  0x47   : > { %s1404_s3 = scalar_lea.vmem (!%p1353_p12), [#allocation2], %s1400_s30  ;;  %p1994_p6 = scmp.ne.s32.totalorder (!%p1353_p12), %s1989_s20, 0 }
  0x4a   : > { %1192 = dma.done.wait (%p1994_p6), %s164_s4, 8192  }
  0x4b   : > { %1194 = vsyncadd (%p1994_p6), %s164_s4, 4294959104  ;;  %s173_s29 = scalar_lea.sflag [#allocation6], %s1397_s16  ;;  %s1412_s5 = scalar_lea.vmem [#allocation5], %s1400_s30 }
  0x4c   : > { %1196 = dma.done.wait (%p1994_p6), %s173_s29, 8192  }
  0x4d   : > { %1198 = vsyncadd (%p1994_p6), %s173_s29, 4294959104  ;;  %v202_v0 = vlaneseq  ;;  %v651_v14 = vld [vmem:[%s1404_s3] sm:$0xff]  ;;  %v652_v16 = vld [vmem:[%s1404_s3 + $0x8] sm:$0xff]  ;;  %s1451_s20 = scalar_lea.vmem [#allocation7], %s1400_s30  ;;  %s1037_s6 = sshll.u32 %s1262_s13, 13 }
  0x4e   : > { %v715_v15 = vld [vmem:[%s1412_s5] sm:$0xff]  ;;  %v716_v19 = vld [vmem:[%s1412_s5 + $0x8] sm:$0xff]  ;;  %v653_v21 = vld [vmem:[%s1404_s3 + $0x10] sm:$0xff]  ;;  %s921_s14 = sshll.u32 %s1451_s20, 4  ;;  %s1926_s28 = scalar_lea.hbm %s1985_s2, %s1037_s6  ;;  %s1928_s14 = int_to_ptr.vmem [resolvable:$true] %s921_s14 }
  0x4f   : > { %v1418_v1 = vshrl.u32 %v202_v0, 7  ;;  %v717_v22 = vld [vmem:[%s1412_s5 + $0x10] sm:$0xff]  ;;  %v654_v27 = vld [vmem:[%s1404_s3 + $0x18] sm:$0xff]  ;;  %v655_v29 = vld [vmem:[%s1404_s3 + $0x20] sm:$0xff]  ;;  %s908_s19 = scalar_lea.sflag [#allocation4], %s1397_s16  ;;  %s1149_s24 = scalar_lea.vmem %s1928_s14, 8192 }
  0x50   : > { %v718_v28 = vld [vmem:[%s1412_s5 + $0x18] sm:$0xff]  ;;  %v719_v33 = vld [vmem:[%s1412_s5 + $0x20] sm:$0xff]  ;;  %v656_v34 = vld [vmem:[%s1404_s3 + $0x28] sm:$0xff]  ;;  %p1150_p13 = scmp.ne.s32.totalorder %s1928_s14, %s1149_s24  ;;  %p2059_p1 = scmp.ne.s32.totalorder %s1990_s21, 0 }
  0x51   : > { %v239_v2 = vand.u32 1, %v1418_v1  ;;  %v204_v3 = vadd.s32 8, %v1418_v1  ;;  %v205_v4 = vadd.s32 16, %v1418_v1  ;;  %v206_v5 = vadd.s32 24, %v1418_v1  ;;  %v720_v35 = vld [vmem:[%s1412_s5 + $0x28] sm:$0xff]  ;;  %v657_v41 = vld [vmem:[%s1404_s3 + $0x30] sm:$0xff] }
  0x52   : > { %v207_v6 = vadd.s32 32, %v1418_v1  ;;  %v208_v7 = vadd.s32 40, %v1418_v1  ;;  %v209_v8 = vadd.s32 48, %v1418_v1  ;;  %v1428_v9 = vadd.s32 56, %v1418_v1  ;;  %v721_v42 = vld [vmem:[%s1412_s5 + $0x30] sm:$0xff]  ;;  %v658_v43 = vld [vmem:[%s1404_s3 + $0x38] sm:$0xff]  ;;  %p1151_p12 = pnand %p1150_p13, %p2059_p1 }
  0x53   : > { %vm1430_vm0 = vcmp.eq.s32.totalorder %v239_v2, 0  ;;  %v246_v11 = vand.u32 1, %v204_v3  ;;  %v253_v12 = vand.u32 1, %v205_v4  ;;  %v260_v13 = vand.u32 1, %v206_v5  ;;  %v722_v47 = vld [vmem:[%s1412_s5 + $0x38] sm:$0xff]  ;;  %v659_v48 = vld [vmem:[%s1404_s3 + $0x40] sm:$0xff] }
  0x54   : > { %v267_v17 = vand.u32 1, %v207_v6  ;;  %v779_v18 = vsel %vm1430_vm0, %v651_v14, %v715_v15  ;;  %v274_v24 = vand.u32 1, %v208_v7  ;;  %v780_v25 = vsel %vm1430_vm0, %v652_v16, %v716_v19  ;;  %v723_v49 = vld [vmem:[%s1412_s5 + $0x40] sm:$0xff]  ;;  %v660_v55 = vld [vmem:[%s1404_s3 + $0x48] sm:$0xff]  ;;  %v661_v57 = vld [vmem:[%s1404_s3 + $0x50] sm:$0xff]  ;;  %p1152_p7 = pneg %p1151_p12  ;;  %s1223_s26 = smov [#allocation7]  }
  0x55   : > { %vm1440_vm1 = vcmp.eq.s32.totalorder %v246_v11, 0  ;;  %vm1446_vm2 = vcmp.eq.s32.totalorder %v253_v12, 0  ;;  %843 = vst [vmem:[%s1451_s20] sm:$0xff] %v779_v18  ;;  %vm1461_vm3 = vcmp.eq.s32.totalorder %v260_v13, 0  ;;  %v281_v31 = vand.u32 1, %v209_v8  ;;  %844 = vst [vmem:[%s1451_s20 + $0x8] sm:$0xff] %v780_v25  ;;  %v724_v56 = vld [vmem:[%s1412_s5 + $0x48] sm:$0xff] }
  0x56   : > { %v781_v26 = vsel %vm1440_vm1, %v653_v21, %v717_v22  ;;  %v782_v32 = vsel %vm1440_vm1, %v654_v27, %v718_v28  ;;  %vm1472_vm4 = vcmp.eq.s32.totalorder %v267_v17, 0  ;;  %v288_v37 = vand.u32 1, %v1428_v9  ;;  %v725_v61 = vld [vmem:[%s1412_s5 + $0x50] sm:$0xff]  ;;  %v662_v62 = vld [vmem:[%s1404_s3 + $0x58] sm:$0xff]  ;;  %v663_v6 = vld [vmem:[%s1404_s3 + $0x60] sm:$0xff]  ;;  %s1153_s27 = sshll.u32 %s1223_s26, 4  ;;  %s1154_s27 = int_to_ptr.vmem [resolvable:$false] %s1153_s27 }
  0x57   : > { %845 = vst [vmem:[%s1451_s20 + $0x10] sm:$0xff] %v781_v26  ;;  %v211_v38 = vadd.s32 64, %v1418_v1  ;;  %846 = vst [vmem:[%s1451_s20 + $0x18] sm:$0xff] %v782_v32  ;;  %v783_v39 = vsel %vm1446_vm2, %v655_v29, %v719_v33  ;;  %v784_v40 = vsel %vm1446_vm2, %v656_v34, %v720_v35  ;;  %v212_v44 = vadd.s32 72, %v1418_v1  ;;  %v726_v63 = vld [vmem:[%s1412_s5 + $0x58] sm:$0xff]  ;;  %v727_v7 = vld [vmem:[%s1412_s5 + $0x60] sm:$0xff]  ;;  %p1156_p10 = scmp.lt.s32.totalorder %s1928_s14, %s1154_s27 }
  0x58   : > { %v213_v45 = vadd.s32 80, %v1418_v1  ;;  %847 = vst [vmem:[%s1451_s20 + $0x20] sm:$0xff] %v783_v39  ;;  %848 = vst [vmem:[%s1451_s20 + $0x28] sm:$0xff] %v784_v40  ;;  %v785_v46 = vsel %vm1461_vm3, %v657_v41, %v721_v42  ;;  %vm1495_vm5 = vcmp.eq.s32.totalorder %v274_v24, 0  ;;  %v1500_v52 = vadd.s32 88, %v1418_v1  ;;  %v664_v8 = vld [vmem:[%s1404_s3 + $0x68] sm:$0xff] }
  0x59   : > { %v295_v51 = vand.u32 1, %v211_v38  ;;  %849 = vst [vmem:[%s1451_s20 + $0x30] sm:$0xff] %v785_v46  ;;  %v786_v53 = vsel %vm1461_vm3, %v658_v43, %v722_v47  ;;  %v787_v54 = vsel %vm1472_vm4, %v659_v48, %v723_v49  ;;  %vm1510_vm6 = vcmp.eq.s32.totalorder %v281_v31, 0  ;;  %v728_v12 = vld [vmem:[%s1412_s5 + $0x68] sm:$0xff]  ;;  %v665_v13 = vld [vmem:[%s1404_s3 + $0x70] sm:$0xff]  ;;  %v666_v20 = vld [vmem:[%s1404_s3 + $0x78] sm:$0xff] }
  0x5a   : > { %v302_v59 = vand.u32 1, %v212_v44  ;;  %850 = vst [vmem:[%s1451_s20 + $0x38] sm:$0xff] %v786_v53  ;;  %851 = vst [vmem:[%s1451_s20 + $0x40] sm:$0xff] %v787_v54  ;;  %v788_v60 = vsel %vm1472_vm4, %v660_v55, %v724_v56  ;;  %vm1521_vm7 = vcmp.eq.s32.totalorder %v288_v37, 0  ;;  %v309_v2 = vand.u32 1, %v213_v45  ;;  %v729_v14 = vld [vmem:[%s1412_s5 + $0x70] sm:$0xff] }
  0x5b   : > { %v215_v3 = vadd.s32 96, %v1418_v1  ;;  %852 = vst [vmem:[%s1451_s20 + $0x48] sm:$0xff] %v788_v60  ;;  %v789_v4 = vsel %vm1495_vm5, %v661_v57, %v725_v61  ;;  %v790_v5 = vsel %vm1495_vm5, %v662_v62, %v726_v63  ;;  %vm1534_vm8 = vcmp.eq.s32.totalorder %v295_v51, 0  ;;  %v730_v21 = vld [vmem:[%s1412_s5 + $0x78] sm:$0xff]  ;;  %v667_v22 = vld [vmem:[%s1404_s3 + $0x80] sm:$0xff]  ;;  %v668_v27 = vld [vmem:[%s1404_s3 + $0x88] sm:$0xff] }
  0x5c   : > { %v316_v10 = vand.u32 1, %v1500_v52  ;;  %853 = vst [vmem:[%s1451_s20 + $0x50] sm:$0xff] %v789_v4  ;;  %854 = vst [vmem:[%s1451_s20 + $0x58] sm:$0xff] %v790_v5  ;;  %v791_v11 = vsel %vm1510_vm6, %v663_v6, %v727_v7  ;;  %vm1546_vm9 = vcmp.eq.s32.totalorder %v302_v59, 0  ;;  %v216_v17 = vadd.s32 104, %v1418_v1  ;;  %v731_v26 = vld [vmem:[%s1412_s5 + $0x80] sm:$0xff] }
  0x5d   : > { %v323_v16 = vand.u32 1, %v215_v3  ;;  %855 = vst [vmem:[%s1451_s20 + $0x60] sm:$0xff] %v791_v11  ;;  %v792_v18 = vsel %vm1510_vm6, %v664_v8, %v728_v12  ;;  %v793_v19 = vsel %vm1521_vm7, %v665_v13, %v729_v14  ;;  %v217_v23 = vadd.s32 112, %v1418_v1  ;;  %v732_v28 = vld [vmem:[%s1412_s5 + $0x88] sm:$0xff]  ;;  %v669_v34 = vld [vmem:[%s1404_s3 + $0x90] sm:$0xff]  ;;  %v670_v36 = vld [vmem:[%s1404_s3 + $0x98] sm:$0xff] }
  0x5e   : > { %v1561_v24 = vadd.s32 120, %v1418_v1  ;;  %856 = vst [vmem:[%s1451_s20 + $0x68] sm:$0xff] %v792_v18  ;;  %857 = vst [vmem:[%s1451_s20 + $0x70] sm:$0xff] %v793_v19  ;;  %v794_v25 = vsel %vm1521_vm7, %v666_v20, %v730_v21  ;;  %vm1570_vm10 = vcmp.eq.s32.totalorder %v309_v2, 0  ;;  %v330_v30 = vand.u32 1, %v216_v17  ;;  %v733_v35 = vld [vmem:[%s1412_s5 + $0x90] sm:$0xff] }
  0x5f   : > { %v1575_v31 = vadd.s32 128, %v1418_v1  ;;  %858 = vst [vmem:[%s1451_s20 + $0x78] sm:$0xff] %v794_v25  ;;  %v795_v32 = vsel %vm1534_vm8, %v667_v22, %v731_v26  ;;  %v796_v33 = vsel %vm1534_vm8, %v668_v27, %v732_v28  ;;  %v797_v37 = vsel %vm1546_vm9, %v669_v34, %v733_v35  ;;  %v734_v38 = vld [vmem:[%s1412_s5 + $0x98] sm:$0xff]  ;;  %v671_v39 = vld [vmem:[%s1404_s3 + $0xa0] sm:$0xff]  ;;  %v672_v46 = vld [vmem:[%s1404_s3 + $0xa8] sm:$0xff]  ;;  %s1155_s23 = scalar_lea.vmem %s1154_s27, 16384 }
  0x60   : > { %859 = vst [vmem:[%s1451_s20 + $0x80] sm:$0xff] %v795_v32  ;;  %860 = vst [vmem:[%s1451_s20 + $0x88] sm:$0xff] %v796_v33  ;;  %v735_v40 = vld [vmem:[%s1412_s5 + $0xa0] sm:$0xff]  ;;  %vm1592_vm11 = vcmp.eq.s32.totalorder %v316_v10, 0  ;;  %v337_v42 = vand.u32 1, %v217_v23  ;;  %v220_v43 = vadd.s32 136, %v1418_v1  ;;  %v798_v44 = vsel %vm1546_vm9, %v670_v36, %v734_v38  ;;  %p1157_p0 = scmp.lt.s32.totalorder %s1155_s23, %s1149_s24 }
  0x61   : > { %861 = vst [vmem:[%s1451_s20 + $0x90] sm:$0xff] %v797_v37  ;;  %v799_v45 = vsel %vm1570_vm10, %v671_v39, %v735_v40  ;;  %v736_v47 = vld [vmem:[%s1412_s5 + $0xa8] sm:$0xff]  ;;  %v673_v48 = vld [vmem:[%s1404_s3 + $0xb0] sm:$0xff]  ;;  %vm1605_vm12 = vcmp.eq.s32.totalorder %v323_v16, 0  ;;  %v344_v50 = vand.u32 1, %v1561_v24  ;;  %862 = vst [vmem:[%s1451_s20 + $0x98] sm:$0xff] %v798_v44 }
  0x62   : > { %863 = vst [vmem:[%s1451_s20 + $0xa0] sm:$0xff] %v799_v45  ;;  %v800_v51 = vsel %vm1570_vm10, %v672_v46, %v736_v47  ;;  %v737_v52 = vld [vmem:[%s1412_s5 + $0xb0] sm:$0xff]  ;;  %v674_v53 = vld [vmem:[%s1404_s3 + $0xb8] sm:$0xff]  ;;  %vm1617_vm13 = vcmp.eq.s32.totalorder %v330_v30, 0  ;;  %v351_v56 = vand.u32 1, %v1575_v31  ;;  %v221_v57 = vadd.s32 144, %v1418_v1  ;;  %p1158_p2 = por %p1157_p0, %p1156_p10 }
  0x63   : > { %v738_v54 = vld [vmem:[%s1412_s5 + $0xb8] sm:$0xff]  ;;  %864 = vst [vmem:[%s1451_s20 + $0xa8] sm:$0xff] %v800_v51  ;;  %v801_v58 = vsel %vm1592_vm11, %v673_v48, %v737_v52  ;;  %v675_v60 = vld [vmem:[%s1404_s3 + $0xc0] sm:$0xff]  ;;  %v676_v62 = vld [vmem:[%s1404_s3 + $0xc8] sm:$0xff]  ;;  %v358_v63 = vand.u32 1, %v220_v43  ;;  %v222_v0 = vadd.s32 152, %v1418_v1 }
  0x64   : > { %v802_v59 = vsel %vm1592_vm11, %v674_v53, %v738_v54  ;;  %v739_v61 = vld [vmem:[%s1412_s5 + $0xc0] sm:$0xff]  ;;  %865 = vst [vmem:[%s1451_s20 + $0xb0] sm:$0xff] %v801_v58  ;;  %v740_v3 = vld [vmem:[%s1412_s5 + $0xc8] sm:$0xff]  ;;  %v677_v4 = vld [vmem:[%s1404_s3 + $0xd0] sm:$0xff]  ;;  %vm1639_vm14 = vcmp.eq.s32.totalorder %v337_v42, 0  ;;  %v365_v7 = vand.u32 1, %v221_v57  ;;  %p1159_p4 = pnand %p1158_p2, %p1152_p7 }
  0x65   : > { %866 = vst [vmem:[%s1451_s20 + $0xb8] sm:$0xff] %v802_v59  ;;  %v803_v2 = vsel %vm1605_vm12, %v675_v60, %v739_v61  ;;  %v741_v5 = vld [vmem:[%s1412_s5 + $0xd0] sm:$0xff]  ;;  %v1644_v8 = vadd.s32 160, %v1418_v1  ;;  %v804_v9 = vsel %vm1605_vm12, %v676_v62, %v740_v3  ;;  %v678_v11 = vld [vmem:[%s1404_s3 + $0xd8] sm:$0xff]  ;;  %v679_v13 = vld [vmem:[%s1404_s3 + $0xe0] sm:$0xff]  ;;  %vm1654_vm15 = vcmp.eq.s32.totalorder %v344_v50, 0 }
  0x66   : > { %867 = vst [vmem:[%s1451_s20 + $0xc0] sm:$0xff] %v803_v2  ;;  %v805_v10 = vsel %vm1617_vm13, %v677_v4, %v741_v5  ;;  %v742_v12 = vld [vmem:[%s1412_s5 + $0xd8] sm:$0xff]  ;;  %v1659_v15 = vadd.s32 168, %v1418_v1  ;;  %868 = vst [vmem:[%s1451_s20 + $0xc8] sm:$0xff] %v804_v9  ;;  %v743_v17 = vld [vmem:[%s1412_s5 + $0xe0] sm:$0xff]  ;;  %vm1668_vm0 = vcmp.eq.s32.totalorder %v351_v56, 0 }
  0x67   : > { %869 = vst [vmem:[%s1451_s20 + $0xd0] sm:$0xff] %v805_v10  ;;  %v806_v16 = vsel %vm1617_vm13, %v678_v11, %v742_v12  ;;  %v680_v18 = vld [vmem:[%s1404_s3 + $0xe8] sm:$0xff]  ;;  %v372_v21 = vand.u32 1, %v222_v0  ;;  %v1673_v22 = vadd.s32 176, %v1418_v1  ;;  %v807_v23 = vsel %vm1639_vm14, %v679_v13, %v743_v17  ;;  %v681_v25 = vld [vmem:[%s1404_s3 + $0xf0] sm:$0xff]  ;;  %v682_v27 = vld [vmem:[%s1404_s3 + $0xf8] sm:$0xff] }
  0x68   : > { %v744_v19 = vld [vmem:[%s1412_s5 + $0xe8] sm:$0xff]  ;;  %870 = vst [vmem:[%s1451_s20 + $0xd8] sm:$0xff] %v806_v16  ;;  %v745_v26 = vld [vmem:[%s1412_s5 + $0xf0] sm:$0xff]  ;;  %vm1683_vm1 = vcmp.eq.s32.totalorder %v358_v63, 0  ;;  %871 = vst [vmem:[%s1451_s20 + $0xe0] sm:$0xff] %v807_v23  ;;  %vm1694_vm2 = vcmp.eq.s32.totalorder %v365_v7, 0 }
  0x69   : > { %v808_v24 = vsel %vm1639_vm14, %v680_v18, %v744_v19  ;;  %v809_v29 = vsel %vm1654_vm15, %v681_v25, %v745_v26  ;;  %v746_v30 = vld [vmem:[%s1412_s5 + $0xf8] sm:$0xff]  ;;  %v683_v31 = vld [vmem:[%s1404_s3 + $0x100] sm:$0xff]  ;;  %v379_v34 = vand.u32 1, %v1644_v8  ;;  %v226_v35 = vadd.s32 184, %v1418_v1  ;;  %v684_v38 = vld [vmem:[%s1404_s3 + $0x108] sm:$0xff] }
  0x6a   : > { %872 = vst [vmem:[%s1451_s20 + $0xe8] sm:$0xff] %v808_v24  ;;  %v747_v32 = vld [vmem:[%s1412_s5 + $0x100] sm:$0xff]  ;;  %873 = vst [vmem:[%s1451_s20 + $0xf0] sm:$0xff] %v809_v29  ;;  %v810_v36 = vsel %vm1654_vm15, %v682_v27, %v746_v30  ;;  %v748_v39 = vld [vmem:[%s1412_s5 + $0x108] sm:$0xff]  ;;  %v386_v41 = vand.u32 1, %v1659_v15  ;;  %v227_v42 = vadd.s32 192, %v1418_v1 }
  0x6b   : > { %v811_v37 = vsel %vm1668_vm0, %v683_v31, %v747_v32  ;;  %v685_v40 = vld [vmem:[%s1404_s3 + $0x110] sm:$0xff]  ;;  %874 = vst [vmem:[%s1451_s20 + $0xf8] sm:$0xff] %v810_v36  ;;  %v812_v43 = vsel %vm1668_vm0, %v684_v38, %v748_v39  ;;  %v686_v45 = vld [vmem:[%s1404_s3 + $0x118] sm:$0xff]  ;;  %vm1717_vm3 = vcmp.eq.s32.totalorder %v372_v21, 0  ;;  %v393_v48 = vand.u32 1, %v1673_v22  ;;  %v687_v52 = vld [vmem:[%s1404_s3 + $0x120] sm:$0xff] }
  0x6c   : > { %875 = vst [vmem:[%s1451_s20 + $0x100] sm:$0xff] %v811_v37  ;;  %v749_v44 = vld [vmem:[%s1412_s5 + $0x110] sm:$0xff]  ;;  %v750_v46 = vld [vmem:[%s1412_s5 + $0x118] sm:$0xff]  ;;  %v1723_v49 = vadd.s32 200, %v1418_v1  ;;  %876 = vst [vmem:[%s1451_s20 + $0x108] sm:$0xff] %v812_v43  ;;  %v400_v55 = vand.u32 1, %v226_v35 }
  0x6d   : > { %v813_v50 = vsel %vm1683_vm1, %v685_v40, %v749_v44  ;;  %v814_v51 = vsel %vm1683_vm1, %v686_v45, %v750_v46  ;;  %v751_v53 = vld [vmem:[%s1412_s5 + $0x120] sm:$0xff]  ;;  %v688_v54 = vld [vmem:[%s1404_s3 + $0x128] sm:$0xff]  ;;  %v689_v58 = vld [vmem:[%s1404_s3 + $0x130] sm:$0xff]  ;;  %vm1740_vm4 = vcmp.eq.s32.totalorder %v379_v34, 0  ;;  %v407_v61 = vand.u32 1, %v227_v42 }
  0x6e   : > { %877 = vst [vmem:[%s1451_s20 + $0x110] sm:$0xff] %v813_v50  ;;  %878 = vst [vmem:[%s1451_s20 + $0x118] sm:$0xff] %v814_v51  ;;  %v815_v56 = vsel %vm1694_vm2, %v687_v52, %v751_v53  ;;  %v752_v57 = vld [vmem:[%s1412_s5 + $0x128] sm:$0xff]  ;;  %v753_v59 = vld [vmem:[%s1412_s5 + $0x130] sm:$0xff]  ;;  %v1745_v62 = vadd.s32 208, %v1418_v1  ;;  %vm1755_vm5 = vcmp.eq.s32.totalorder %v386_v41, 0 }
  0x6f   : > { %879 = vst [vmem:[%s1451_s20 + $0x120] sm:$0xff] %v815_v56  ;;  %v816_v63 = vsel %vm1694_vm2, %v688_v54, %v752_v57  ;;  %v817_v0 = vsel %vm1717_vm3, %v689_v58, %v753_v59  ;;  %v690_v2 = vld [vmem:[%s1404_s3 + $0x138] sm:$0xff]  ;;  %v691_v4 = vld [vmem:[%s1404_s3 + $0x140] sm:$0xff]  ;;  %v1760_v6 = vadd.s32 216, %v1418_v1  ;;  %v692_v9 = vld [vmem:[%s1404_s3 + $0x148] sm:$0xff]  ;;  %vm1769_vm6 = vcmp.eq.s32.totalorder %v393_v48, 0 }
  0x70   : > { %v754_v3 = vld [vmem:[%s1412_s5 + $0x138] sm:$0xff]  ;;  %880 = vst [vmem:[%s1451_s20 + $0x128] sm:$0xff] %v816_v63  ;;  %881 = vst [vmem:[%s1451_s20 + $0x130] sm:$0xff] %v817_v0  ;;  %v755_v8 = vld [vmem:[%s1412_s5 + $0x140] sm:$0xff]  ;;  %v414_v12 = vand.u32 1, %v1723_v49  ;;  %v231_v13 = vadd.s32 224, %v1418_v1 }
  0x71   : > { %v818_v7 = vsel %vm1717_vm3, %v690_v2, %v754_v3  ;;  %v756_v10 = vld [vmem:[%s1412_s5 + $0x148] sm:$0xff]  ;;  %v819_v14 = vsel %vm1740_vm4, %v691_v4, %v755_v8  ;;  %v693_v16 = vld [vmem:[%s1404_s3 + $0x150] sm:$0xff]  ;;  %v694_v18 = vld [vmem:[%s1404_s3 + $0x158] sm:$0xff]  ;;  %vm1783_vm7 = vcmp.eq.s32.totalorder %v400_v55, 0  ;;  %vm1794_vm8 = vcmp.eq.s32.totalorder %v407_v61, 0 }
  0x72   : > { %882 = vst [vmem:[%s1451_s20 + $0x138] sm:$0xff] %v818_v7  ;;  %v820_v15 = vsel %vm1740_vm4, %v692_v9, %v756_v10  ;;  %v757_v17 = vld [vmem:[%s1412_s5 + $0x150] sm:$0xff]  ;;  %883 = vst [vmem:[%s1451_s20 + $0x140] sm:$0xff] %v819_v14  ;;  %v758_v21 = vld [vmem:[%s1412_s5 + $0x158] sm:$0xff]  ;;  %v421_v25 = vand.u32 1, %v1745_v62  ;;  %v232_v26 = vadd.s32 232, %v1418_v1 }
  0x73   : > { %884 = vst [vmem:[%s1451_s20 + $0x148] sm:$0xff] %v820_v15  ;;  %v821_v20 = vsel %vm1755_vm5, %v693_v16, %v757_v17  ;;  %v695_v22 = vld [vmem:[%s1404_s3 + $0x160] sm:$0xff]  ;;  %v822_v27 = vsel %vm1755_vm5, %v694_v18, %v758_v21  ;;  %v696_v29 = vld [vmem:[%s1404_s3 + $0x168] sm:$0xff]  ;;  %v697_v31 = vld [vmem:[%s1404_s3 + $0x170] sm:$0xff]  ;;  %v428_v32 = vand.u32 1, %v1760_v6  ;;  %v233_v33 = vadd.s32 240, %v1418_v1 }
  0x74   : > { %v759_v23 = vld [vmem:[%s1412_s5 + $0x160] sm:$0xff]  ;;  %885 = vst [vmem:[%s1451_s20 + $0x150] sm:$0xff] %v821_v20  ;;  %v760_v30 = vld [vmem:[%s1412_s5 + $0x168] sm:$0xff]  ;;  %886 = vst [vmem:[%s1451_s20 + $0x158] sm:$0xff] %v822_v27  ;;  %vm1817_vm9 = vcmp.eq.s32.totalorder %v414_v12, 0  ;;  %v435_v39 = vand.u32 1, %v231_v13 }
  0x75   : > { %v823_v28 = vsel %vm1769_vm6, %v695_v22, %v759_v23  ;;  %v824_v34 = vsel %vm1769_vm6, %v696_v29, %v760_v30  ;;  %v761_v35 = vld [vmem:[%s1412_s5 + $0x170] sm:$0xff]  ;;  %v698_v36 = vld [vmem:[%s1404_s3 + $0x178] sm:$0xff]  ;;  %v234_v40 = vadd.s32 248, %v1418_v1  ;;  %v699_v43 = vld [vmem:[%s1404_s3 + $0x180] sm:$0xff]  ;;  %vm1837_vm10 = vcmp.eq.s32.totalorder %v421_v25, 0 }
  0x76   : > { %887 = vst [vmem:[%s1451_s20 + $0x160] sm:$0xff] %v823_v28  ;;  %v762_v37 = vld [vmem:[%s1412_s5 + $0x178] sm:$0xff]  ;;  %888 = vst [vmem:[%s1451_s20 + $0x168] sm:$0xff] %v824_v34  ;;  %v825_v41 = vsel %vm1783_vm7, %v697_v31, %v761_v35  ;;  %v763_v44 = vld [vmem:[%s1412_s5 + $0x180] sm:$0xff]  ;;  %v442_v50 = vand.u32 1, %v232_v26  ;;  %vm1849_vm11 = vcmp.eq.s32.totalorder %v428_v32, 0 }
  0x77   : > { %v826_v42 = vsel %vm1783_vm7, %v698_v36, %v762_v37  ;;  %v700_v45 = vld [vmem:[%s1404_s3 + $0x188] sm:$0xff]  ;;  %889 = vst [vmem:[%s1451_s20 + $0x170] sm:$0xff] %v825_v41  ;;  %v827_v1 = vsel %vm1794_vm8, %v699_v43, %v763_v44  ;;  %v701_v47 = vld [vmem:[%s1404_s3 + $0x190] sm:$0xff]  ;;  %v702_v53 = vld [vmem:[%s1404_s3 + $0x198] sm:$0xff]  ;;  %v449_v57 = vand.u32 1, %v233_v33  ;;  %vm1860_vm12 = vcmp.eq.s32.totalorder %v435_v39, 0 }
  0x78   : > { %890 = vst [vmem:[%s1451_s20 + $0x178] sm:$0xff] %v826_v42  ;;  %v764_v46 = vld [vmem:[%s1412_s5 + $0x188] sm:$0xff]  ;;  %v765_v48 = vld [vmem:[%s1412_s5 + $0x190] sm:$0xff]  ;;  %891 = vst [vmem:[%s1451_s20 + $0x180] sm:$0xff] %v827_v1  ;;  %v456_v63 = vand.u32 1, %v234_v40  ;;  %vm1879_vm13 = vcmp.eq.s32.totalorder %v442_v50, 0 }
  0x79   : > { %v828_v51 = vsel %vm1794_vm8, %v700_v45, %v764_v46  ;;  %v829_v52 = vsel %vm1817_vm9, %v701_v47, %v765_v48  ;;  %v766_v54 = vld [vmem:[%s1412_s5 + $0x198] sm:$0xff]  ;;  %v703_v55 = vld [vmem:[%s1404_s3 + $0x1a0] sm:$0xff]  ;;  %v704_v60 = vld [vmem:[%s1404_s3 + $0x1a8] sm:$0xff]  ;;  %vm1891_vm14 = vcmp.eq.s32.totalorder %v449_v57, 0 }
  0x7a   : > { %892 = vst [vmem:[%s1451_s20 + $0x188] sm:$0xff] %v828_v51  ;;  %893 = vst [vmem:[%s1451_s20 + $0x190] sm:$0xff] %v829_v52  ;;  %v830_v58 = vsel %vm1817_vm9, %v702_v53, %v766_v54  ;;  %v767_v59 = vld [vmem:[%s1412_s5 + $0x1a0] sm:$0xff]  ;;  %v768_v61 = vld [vmem:[%s1412_s5 + $0x1a8] sm:$0xff]  ;;  %vm1904_vm15 = vcmp.eq.s32.totalorder %v456_v63, 0 }
  0x7b   : > { %894 = vst [vmem:[%s1451_s20 + $0x198] sm:$0xff] %v830_v58  ;;  %v831_v0 = vsel %vm1837_vm10, %v703_v55, %v767_v59  ;;  %v832_v2 = vsel %vm1837_vm10, %v704_v60, %v768_v61  ;;  %v705_v3 = vld [vmem:[%s1404_s3 + $0x1b0] sm:$0xff]  ;;  %v706_v5 = vld [vmem:[%s1404_s3 + $0x1b8] sm:$0xff]  ;;  %v707_v8 = vld [vmem:[%s1404_s3 + $0x1c0] sm:$0xff] }
  0x7c   : > { %v769_v4 = vld [vmem:[%s1412_s5 + $0x1b0] sm:$0xff]  ;;  %895 = vst [vmem:[%s1451_s20 + $0x1a0] sm:$0xff] %v831_v0  ;;  %896 = vst [vmem:[%s1451_s20 + $0x1a8] sm:$0xff] %v832_v2  ;;  %v770_v7 = vld [vmem:[%s1412_s5 + $0x1b8] sm:$0xff] }
  0x7d   : > { %v833_v6 = vsel %vm1849_vm11, %v705_v3, %v769_v4  ;;  %v771_v9 = vld [vmem:[%s1412_s5 + $0x1c0] sm:$0xff]  ;;  %v834_v11 = vsel %vm1849_vm11, %v706_v5, %v770_v7  ;;  %v708_v13 = vld [vmem:[%s1404_s3 + $0x1c8] sm:$0xff]  ;;  %v709_v15 = vld [vmem:[%s1404_s3 + $0x1d0] sm:$0xff] }
  0x7e   : > { %897 = vst [vmem:[%s1451_s20 + $0x1b0] sm:$0xff] %v833_v6  ;;  %v835_v12 = vsel %vm1860_vm12, %v707_v8, %v771_v9  ;;  %v772_v14 = vld [vmem:[%s1412_s5 + $0x1c8] sm:$0xff]  ;;  %898 = vst [vmem:[%s1451_s20 + $0x1b8] sm:$0xff] %v834_v11  ;;  %v773_v18 = vld [vmem:[%s1412_s5 + $0x1d0] sm:$0xff] }
  0x7f   : > { %899 = vst [vmem:[%s1451_s20 + $0x1c0] sm:$0xff] %v835_v12  ;;  %v836_v17 = vsel %vm1860_vm12, %v708_v13, %v772_v14  ;;  %v710_v19 = vld [vmem:[%s1404_s3 + $0x1d8] sm:$0xff]  ;;  %v837_v22 = vsel %vm1879_vm13, %v709_v15, %v773_v18  ;;  %v711_v24 = vld [vmem:[%s1404_s3 + $0x1e0] sm:$0xff]  ;;  %v712_v26 = vld [vmem:[%s1404_s3 + $0x1e8] sm:$0xff] }
  0x80   : > { %v774_v20 = vld [vmem:[%s1412_s5 + $0x1d8] sm:$0xff]  ;;  %900 = vst [vmem:[%s1451_s20 + $0x1c8] sm:$0xff] %v836_v17  ;;  %v775_v25 = vld [vmem:[%s1412_s5 + $0x1e0] sm:$0xff]  ;;  %901 = vst [vmem:[%s1451_s20 + $0x1d0] sm:$0xff] %v837_v22 }
  0x81   : > { %v838_v23 = vsel %vm1879_vm13, %v710_v19, %v774_v20  ;;  %v839_v27 = vsel %vm1891_vm14, %v711_v24, %v775_v25  ;;  %v776_v28 = vld [vmem:[%s1412_s5 + $0x1e8] sm:$0xff]  ;;  %v713_v29 = vld [vmem:[%s1404_s3 + $0x1f0] sm:$0xff]  ;;  %v714_v33 = vld [vmem:[%s1404_s3 + $0x1f8] sm:$0xff] }
  0x82   : > { %902 = vst [vmem:[%s1451_s20 + $0x1d8] sm:$0xff] %v838_v23  ;;  %v777_v30 = vld [vmem:[%s1412_s5 + $0x1f0] sm:$0xff]  ;;  %903 = vst [vmem:[%s1451_s20 + $0x1e0] sm:$0xff] %v839_v27  ;;  %v840_v31 = vsel %vm1891_vm14, %v712_v26, %v776_v28  ;;  %v778_v34 = vld [vmem:[%s1412_s5 + $0x1f8] sm:$0xff] }
  0x83   : > { %v841_v32 = vsel %vm1904_vm15, %v713_v29, %v777_v30  ;;  %904 = vst [vmem:[%s1451_s20 + $0x1e8] sm:$0xff] %v840_v31  ;;  %v842_v35 = vsel %vm1904_vm15, %v714_v33, %v778_v34 }
  0x84   : > { %905 = vst [vmem:[%s1451_s20 + $0x1f0] sm:$0xff] %v841_v32  ;;  %906 = vst [vmem:[%s1451_s20 + $0x1f8] sm:$0xff] %v842_v35 }
  0x85   : > { %1162 = shalt.err (!%p1159_p4)
}
  0x86   : > { %s1163_s25 = scalar_lea.hbm %s1926_s28, 8192  ;;  %s1167_s30 = scalar_lea.hbm %s1985_s2, 16384 }
  0x87   : > { %p1164_p9 = scmp.ne.s32.totalorder %s1926_s28, %s1163_s25  ;;  %p1168_p5 = scmp.lt.s32.totalorder %s1926_s28, %s1985_s2 }
  0x88   : > { %p1169_p8 = scmp.lt.s32.totalorder %s1167_s30, %s1163_s25 }
  0x89   : > { %p1165_p11 = pnand %p1164_p9, %p2059_p1 }
  0x8a   : > { %p1170_p6 = por %p1169_p8, %p1168_p5 }
  0x8b   : > { %p1166_p3 = pneg %p1165_p11 }
  0x8d   : > { %p1171_p13 = pnand %p1170_p6, %p1166_p3 }
  0x8f   : > { %1174 = shalt.err (!%p1171_p13)
}
  0x90   : > { %s1224_s29 = smov 256   ;;  %s1225_s5 = smov 16  }
  0x91   : > { %1042 = dma.vmem_to_hbm [thread:$0]  (%p2059_p1), %s1928_s14, 8192, %s1926_s28, %s908_s19, %s1224_s29, %s1224_s29, %s1225_s5  }
  0x92 PF: > { %s936_s20 = sand.u32 1, %s1205_s9   ;;  %p2060_p12 = scmp.ne.s32.totalorder %s1991_s22, 0 }
  0x93   : > { %p2061_p7 = scmp.ge.s32.totalorder %s1217_s12, 2  ;;  %s937_s6 = scalar_lea.sflag [#allocation4], %s936_s20 }
  0x95   : > { %p1052_p10 = pnand %p2061_p7, %p2060_p12 }
  0x97   : > { %p1053_p0 = pneg %p1052_p10 }
  0x99   : > { %1200 = dma.done.wait (%p1053_p0), %s937_s6, 8192  }
  0x9a   : > { %1202 = vsyncadd (%p1053_p0), %s937_s6, 4294959104  ;;  %p18_p2 = scmp.ge.s32.totalorder %s1266_s15, 4   ;;  %s2062_s9 = smov %s1209_s10 }
  0x9b   : > { %s2063_s10 = smov %s1213_s11  ;;  %s2064_s11 = smov %s1278_s18 }
  0x9c   : > { %s2065_s12 = smov %s1266_s15  ;;  %20 = sbr.rel (!%p18_p2) target bundleno = 7 (0x7), region = 86 }
  0xa1   :  { %942 = vsyncpa [#allocation3], 1 }
  0xa2   :  { %944 = vsyncpa [#allocation3 + $0x1], 1 }
  0xa3   :  { %945 = vsyncpa [#allocation6], 1 }
  0xa4   :  { %947 = vsyncpa [#allocation6 + $0x1], 1 }
  0xa5   :  { %948 = vsyncpa [#allocation4], 1 }
  0xa6   :  { %950 = vsyncpa [#allocation4 + $0x1], 1 }

</bundles_post_ra>
